<compile_context>
chip_gen: v6e
topology: v6e:2x2x1
jax: 0.10.0
libtpu: 0.0.40
codegen_flags: <defaults>
</compile_context>

<pallas_src>
import functools

import jax
import jax.numpy as jnp
from jax.experimental import pallas as pl
from jax.experimental.pallas import tpu as pltpu

_LANE = 128
_VMEM_LIMIT = 32 << 20          # explicit scoped-VMEM limit (safe on v5e/v6e/v7x)
_VMEM_WORK_BUDGET = 24 << 20    # working-buffer budget used for tile sizing


def _round_up(x, m):
    return ((x + m - 1) // m) * m


def _softmax_model_kernel(num_classes, x_ref, wt_ref, b_ref, o_ref):
    # logits = x @ W^T + b  — bf16 MXU matmul, f32 accumulation.
    # (If x is already bf16 the astype is a no-op.)
    x_bf16 = x_ref[...].astype(jnp.bfloat16)
    logits = jnp.dot(x_bf16, wt_ref[...], preferred_element_type=jnp.float32)
    logits = logits + b_ref[...]
    # Numerically-stable softmax over the (lane-padded) class axis.  Padded
    # classes carry bias -1e30 -> exp underflows to exactly 0, so they never
    # perturb the max or the denominator of the real classes.
    m = jnp.max(logits, axis=-1, keepdims=True)
    e = jnp.exp(logits - m)
    denom = jnp.sum(e, axis=-1, keepdims=True)
    probs = e / denom                               # exact normalization
    # Store only the real classes; the output block/array is unpadded.
    o_ref[...] = probs[:, :num_classes].astype(o_ref.dtype)


def prepare_params(w, b):
    """One-time (deploy-time) parameter prep.

    w: [C, D] float32, b: [C] float32
    returns:
      w_t_pad: [D, Cp] bfloat16  (Cp = C padded up to a multiple of 128 lanes,
                                  extra columns are zero)
      b_pad:   [1, Cp] float32   (extra columns are -1e30)
    """
    c, d = w.shape
    cp = max(_LANE, _round_up(c, _LANE))
    w_t_pad = (
        jnp.zeros((d, cp), jnp.bfloat16).at[:, :c].set(w.T.astype(jnp.bfloat16))
    )
    b_pad = (
        jnp.full((1, cp), -1e30, jnp.float32).at[0, :c].set(b.astype(jnp.float32))
    )
    return w_t_pad, b_pad


def _choose_tile_n(n, d, cp, c, x_bytes, out_bytes):
    """Batch-tile size derived from a VMEM budget (works on 64 MiB v7x VMEM)."""
    # Resident across the grid: bf16 weight + f32 bias (double-buffered worst
    # case — we do not rely on pl.Buffered(1) for the constant-index specs).
    resident = d * cp * 2 * 2 + cp * 4 * 2
    # Per batch row: x (double-buffered) + unpadded output (double-buffered)
    # + ~3 f32 intermediates at Cp lanes (logits, e, probs).
    per_row = d * x_bytes * 2 + c * out_bytes * 2 + 3 * cp * 4
    avail = max(_VMEM_WORK_BUDGET - resident, 8 * per_row)
    tile = (avail // per_row) // 8 * 8
    tile = max(tile, 8)
    if n >= 16:
        # Keep >= 2 grid steps when there is enough work so the "parallel"
        # axis can shard across both v7x TensorCores (harmless on v5e/v6e).
        tile = min(tile, _round_up(pl.cdiv(n, 2), 8))
    tile = min(tile, 8192, _round_up(n, 8))
    return max(8, tile)


def softmax_model(x, w_t_pad, b_pad, num_classes, out_dtype=jnp.float32):
    """x: [N, D] -> softmax(x @ W^T + b, dim=1) as [N, num_classes]."""
    n, d = x.shape
    dp, cp = w_t_pad.shape
    assert dp == d and b_pad.shape == (1, cp)
    c = num_classes

    x_bytes = jnp.dtype(x.dtype).itemsize
    out_bytes = jnp.dtype(out_dtype).itemsize
    tile_n = _choose_tile_n(n, d, cp, c, x_bytes, out_bytes)
    grid = (pl.cdiv(n, tile_n),)

    cost = pl.CostEstimate(
        flops=2 * n * d * cp,
        transcendentals=n * cp,  # exp
        bytes_accessed=(n * d * x_bytes) + (d * cp * 2) + (cp * 4)
        + (n * c * out_bytes),
    )

    kernel = functools.partial(_softmax_model_kernel, c)

    return pl.pallas_call(
        kernel,
        out_shape=jax.ShapeDtypeStruct((n, c), out_dtype),
        grid_spec=pltpu.PrefetchScalarGridSpec(
            num_scalar_prefetch=0,
            grid=grid,
            in_specs=[
                # x: streamed per batch tile, default double-buffering.
                pl.BlockSpec((tile_n, d), lambda i: (i, 0)),
                # weight / bias: resident across all grid steps.
                pl.BlockSpec((d, cp), lambda i: (0, 0)),
                pl.BlockSpec((1, cp), lambda i: (0, 0)),
            ],
            # Unpadded output: block last dim == full array dim (legal even
            # though C < 128); stores are masked but HBM writeback is 8x
            # smaller than the padded version for C=16.
            out_specs=pl.BlockSpec((tile_n, c), lambda i: (i, 0)),
        ),
        compiler_params=pltpu.CompilerParams(
            dimension_semantics=("parallel",),   # megacore-shardable on v7x
            vmem_limit_bytes=_VMEM_LIMIT,
        ),
        cost_estimate=cost,
    )(x, w_t_pad, b_pad)


if __name__ == "__main__":
    # Small deterministic shapes: batch=8, hidden=32, num_classes=16
    key = jax.random.PRNGKey(0)
    kx, kw, kb = jax.random.split(key, 3)
    batch, hidden, num_classes = 8, 32, 16

    x = jax.random.normal(kx, (batch, hidden), dtype=jnp.float32)
    w = jax.random.normal(kw, (num_classes, hidden), dtype=jnp.float32) * 0.1
    b = jax.random.normal(kb, (num_classes,), dtype=jnp.float32) * 0.1

    # Deploy-time parameter prep (done once), then the fused forward pass.
    w_t_pad, b_pad = prepare_params(w, b)
    out = softmax_model(x, w_t_pad, b_pad, num_classes)
    out = jax.block_until_ready(out)

    # reference check (plain JAX, f32).  Tolerance accounts for the bf16 MXU
    # matmul path.
    ref = jax.nn.softmax(x @ w.T + b, axis=1)
    assert out.shape == (batch, num_classes)
    assert jnp.allclose(out, ref, atol=5e-3), "mismatch vs reference"
    assert jnp.allclose(jnp.sum(out, axis=1), 1.0, atol=1e-5)

    print("KERNEL_OK")
</pallas_src>

<mosaic_0001>
module attributes {stable_mosaic.version = 11 : i64} {
  func.func @_softmax_model_kernel(%arg0: i32, %arg1: memref<8x32xf32, #tpu.memory_space<vmem>>, %arg2: memref<32x128xbf16, #tpu.memory_space<vmem>>, %arg3: memref<1x128xf32, #tpu.memory_space<vmem>>, %arg4: memref<8x16xf32, #tpu.memory_space<vmem>>) attributes {dimension_semantics = [#tpu.dimension_semantics<parallel>], iteration_bounds = array<i64: 1>, scalar_prefetch = 0 : i64, scratch_operands = 0 : i64, tpu.core_type = #tpu.core_type<tc>, window_params = [{transform_indices = @transform_0, window_bounds = array<i64: 8, 32>}, {pipeline_mode = #tpu.pipeline_mode<synchronous>, transform_indices = @transform_1, window_bounds = array<i64: 32, 128>}, {pipeline_mode = #tpu.pipeline_mode<synchronous>, transform_indices = @transform_2, window_bounds = array<i64: 1, 128>}, {transform_indices = @transform_3, window_bounds = array<i64: 8, 16>}]} {
    %c0 = arith.constant 0 : index
    %c0_0 = arith.constant 0 : index
    %0 = vector.load %arg1[%c0, %c0_0] : memref<8x32xf32, #tpu.memory_space<vmem>>, vector<8x32xf32>
    %1 = arith.truncf %0 : vector<8x32xf32> to vector<8x32xbf16>
    %c0_1 = arith.constant 0 : index
    %c0_2 = arith.constant 0 : index
    %2 = vector.load %arg2[%c0_1, %c0_2] : memref<32x128xbf16, #tpu.memory_space<vmem>>, vector<32x128xbf16>
    %cst = arith.constant dense<0.000000e+00> : vector<8x128xf32>
    %3 = tpu.matmul %1, %2, %cst {dimension_numbers = #tpu.dot_dimension_numbers<[1], [0], [0], [1], [0, 0, 1, 1], [], []>} : vector<8x32xbf16>, vector<32x128xbf16>, vector<8x128xf32> -> vector<8x128xf32>
    %c0_3 = arith.constant 0 : index
    %c0_4 = arith.constant 0 : index
    %4 = vector.load %arg3[%c0_3, %c0_4] : memref<1x128xf32, #tpu.memory_space<vmem>>, vector<1x128xf32>
    %5 = vector.broadcast %4 : vector<1x128xf32> to vector<8x128xf32>
    %6 = arith.addf %3, %5 : vector<8x128xf32>
    %cst_5 = arith.constant dense<0xFF800000> : vector<8xf32>
    %7 = vector.multi_reduction <maximumf>, %6, %cst_5 [1] : vector<8x128xf32> to vector<8xf32>
    %8 = vector.shape_cast %7 : vector<8xf32> to vector<8x1xf32>
    %9 = vector.broadcast %8 : vector<8x1xf32> to vector<8x128xf32>
    %10 = arith.subf %6, %9 : vector<8x128xf32>
    %11 = math.exp %10 : vector<8x128xf32>
    %cst_6 = arith.constant dense<0.000000e+00> : vector<8xf32>
    %12 = vector.multi_reduction <add>, %11, %cst_6 [1] : vector<8x128xf32> to vector<8xf32>
    %13 = vector.shape_cast %12 : vector<8xf32> to vector<8x1xf32>
    %14 = vector.broadcast %13 : vector<8x1xf32> to vector<8x128xf32>
    %15 = arith.divf %11, %14 : vector<8x128xf32>
    %16 = vector.extract_strided_slice %15 {offsets = [0, 0], sizes = [8, 16], strides = [1, 1]} : vector<8x128xf32> to vector<8x16xf32>
    %c0_7 = arith.constant 0 : index
    %c0_8 = arith.constant 0 : index
    %17 = vector.load %arg4[%c0_7, %c0_8] : memref<8x16xf32, #tpu.memory_space<vmem>>, vector<8x16xf32>
    tpu.vector_store %arg4[%c0_7, %c0_8], %16 {strides = array<i32>} : memref<8x16xf32, #tpu.memory_space<vmem>>, vector<8x16xf32>,
    return
  }
  func.func @transform_0(%arg0: i32) -> (i32, i32) {
    %c0_i32 = arith.constant 0 : i32
    %c0_i32_0 = arith.constant 0 : i32
    return %arg0, %c0_i32 : i32, i32
  }
  func.func @transform_1(%arg0: i32) -> (i32, i32) {
    %c0_i32 = arith.constant 0 : i32
    %c0_i32_0 = arith.constant 0 : i32
    %c0_i32_1 = arith.constant 0 : i32
    return %c0_i32, %c0_i32_0 : i32, i32
  }
  func.func @transform_2(%arg0: i32) -> (i32, i32) {
    %c0_i32 = arith.constant 0 : i32
    %c0_i32_0 = arith.constant 0 : i32
    %c0_i32_1 = arith.constant 0 : i32
    return %c0_i32, %c0_i32_0 : i32, i32
  }
  func.func @transform_3(%arg0: i32) -> (i32, i32) {
    %c0_i32 = arith.constant 0 : i32
    %c0_i32_0 = arith.constant 0 : i32
    return %arg0, %c0_i32 : i32, i32
  }
}

</mosaic_0001>

<bundles_post_ra>
// kernel: tpu_custom_call.1
= control target key start
LH: loop header
LB: loop body
LE: loop exit
PB: predicated region body
PF: predicated region fallthrough
CT: control target
= control target key end

     0   :  { %8 = vsyncpa [#allocation3], 0  ;;  %s271_s0 = inlined_call_operand.hbm [shape: f32[8,32], index: 0, kind: input, shape index: {}]   ;;  %s272_s1 = inlined_call_operand.hbm [shape: bf16[32,128], index: 1, kind: input, shape index: {}]   ;;  %s273_s2 = inlined_call_operand.vmem [shape: f32[1,128], index: 2, kind: input, shape index: {}]   ;;  %s274_s3 = inlined_call_operand.hbm [shape: f32[8,16], index: 3, kind: output, shape index: {}]  }
   0x1   :  { %9 = vsyncpa [#allocation6], 0 }
   0x2   :  { %10 = vsyncpa [#allocation4], 0  ;;  %s232_s12 = smov [#allocation2]   ;;  %s233_s14 = smov [#allocation5]  }
   0x3   :  { %s17_s13 = sshll.u32 %s232_s12, 4  ;;  %s26_s15 = sshll.u32 %s233_s14, 4  ;;  %s18_s13 = int_to_ptr.vmem [resolvable:$true] %s17_s13  ;;  %s27_s15 = int_to_ptr.vmem [resolvable:$true] %s26_s15 }
   0x4   :  { %s174_s16 = scalar_lea.vmem %s18_s13, 128  ;;  %p179_p1 = scmp.lt.s32.totalorder %s18_s13, %s18_s13 }
   0x5   :  { %p175_p0 = scmp.ne.s32.totalorder %s18_s13, %s174_s16  ;;  %p180_p2 = scmp.lt.s32.totalorder %s174_s16, %s174_s16 }
   0x7   :  { %p181_p3 = por %p180_p2, %p179_p1 }
   0x9   :  { %p182_p4 = pnand %p181_p3, %p175_p0 }
   0xb   :  { %185 = shalt.err (!%p182_p4)
}
   0xc   :  { %20 = dma.hbm_to_vmem [thread:$0]  %s271_s0, 128, %s18_s13, [#allocation3]  }
   0xd   :  { %s194_s19 = scalar_lea.vmem %s27_s15, 256  ;;  %p199_p6 = scmp.lt.s32.totalorder %s27_s15, %s27_s15 }
   0xe   :  { %p195_p5 = scmp.ne.s32.totalorder %s27_s15, %s194_s19  ;;  %p200_p7 = scmp.lt.s32.totalorder %s194_s19, %s194_s19 }
  0x10   :  { %p201_p8 = por %p200_p7, %p199_p6 }
  0x12   :  { %p202_p9 = pnand %p201_p8, %p195_p5 }
  0x14   :  { %205 = shalt.err (!%p202_p9)
}
  0x15   :  { %s234_s20 = smov 64   ;;  %s235_s21 = smov 4  }
  0x16   :  { %32 = dma.hbm_to_vmem [thread:$0]  %s272_s1, 256, %s27_s15, [#allocation6], %s234_s20, %s234_s20, %s235_s21  }
  0x17   :  { %226 = dma.done.wait [#allocation3], 128  }
  0x18   :  { %227 = vsyncadd [#allocation3], 4294967168 }
  0x19   :  { %228 = dma.done.wait [#allocation6], 256  }
  0x1a   :  { %229 = vsyncadd [#allocation6], 4294967040  ;;  %v236_v0 = vmov 0.0   ;;  %vm237_vm0 = vmmov 0   ;;  %v160_v1 = vld [vmem:[#allocation5 + $0x8] sm:$0xff]   ;;  %v161_v2 = vld [vmem:[#allocation5] sm:$0xff]  }
  0x1b   :  { %145 = vmatprep.subr.bf16.mxu0 %v236_v0  ;;  %149 = vmatprep.mubr.msk.bf16.mxu0 %vm237_vm0, %v236_v0  ;;  %v42_v3 = vld [vmem:[#allocation2] sm:$0xff]  ;;  %vm67_vm1 = vcmask 261120   ;;  %s238_s1 = smov [#allocation7]   ;;  %vm120_vm2 = vcmask 130048  }
  0x1c   :  { %146 = vmatpush3.bf16.msra.mxu0 %v160_v1  ;;  %v43_v4 = vpack.c.bf16 %v42_v3, %v42_v3  ;;  %v138_v5 = vld [vmem:[%s273_s2] ss:$0 sm:$0xff]  ;;  %s128_s25 = sshll.u32 %s238_s1, 4  ;;  %s129_s25 = int_to_ptr.vmem [resolvable:$true] %s128_s25 }
  0x1d   :  { %147 = vmatprep.subr.bf16.mxu0 %v236_v0  ;;  %s206_s2 = scalar_lea.vmem %s129_s25, 128  ;;  %p211_p11 = scmp.lt.s32.totalorder %s129_s25, %s129_s25 }
  0x1e   :  { %p207_p10 = scmp.ne.s32.totalorder %s129_s25, %s206_s2  ;;  %p212_p12 = scmp.lt.s32.totalorder %s206_s2, %s206_s2 }
  0x20   :  { %148 = vmatpush3.bf16.msra.mxu0 %v161_v2  ;;  %p213_p13 = por %p212_p12, %p211_p11 }
  0x22   :  { %p214_p0 = pnand %p213_p13, %p207_p10 }
  0x23   :  { %150 = vmatmul.mubr.msk.bf16.vlgmr.msra.gmra.mxu0 %vm67_vm1, %v43_v4 }
  0xe3   :  { %v105_v6 = vpop.f32.mrf.mxu0 }
  0xe4   :  { %v106_v7 = vadd.f32 %v138_v5, %v105_v6 }
  0xe5   :  { %v151_v8 = vpop.f32.mrf.mxu0 }
  0xe6   :  { %111 = vmax.xlane.f32.xlu0 %v106_v7 }
  0xe7   :  { %v108_v9 = vpop.f32.mrf.mxu0 }
  0xe9   :  { %v152_v10 = vpop.f32.mrf.mxu0 }
 0x16f   :  { %v112_v11 = vpop.xlane.xlu0 %111 }
 0x170   :  { %v113_v12 = vsub.f32 %v106_v7, %v112_v11 }
 0x172   :  { %v114_v13 = vmul.f32 1.442695, %v113_v12 }
 0x174   :  { %162 = vpow2.f32 %v114_v13 }
 0x181   :  { %v163_v14 = vpop.eup %162 }
 0x182   :  { %116 = vadd.xlane.f32.xlu0 %v163_v14 }
 0x20b   :  { %v117_v15 = vpop.xlane.xlu0 %116 }
 0x20c   :  { %164 = vrcp.f32 %v117_v15 }
 0x219   :  { %v165_v16 = vpop.eup %164 }
 0x21a   :  { %v119_v17 = vmul.f32 %v165_v16, %v163_v14 }
 0x21c   :  { %121 = vst.msk [vmem:[#allocation7] sm:$0xff] %vm120_vm2, %v119_v17 }
 0x21d   :  { %217 = shalt.err (!%p214_p0)
}
 0x21e   :  { %131 = dma.vmem_to_hbm [thread:$0]  %s129_s25, 128, %s274_s3, [#allocation4]  }
 0x21f   :  { %230 = dma.done.wait [#allocation4], 128  }
 0x220   :  { %231 = vsyncadd [#allocation4], 4294967168 }
 0x221   :  { %135 = vsyncpa [#allocation3], 1 }
 0x222   :  { %136 = vsyncpa [#allocation6], 1 }
 0x223   :  { %137 = vsyncpa [#allocation4], 1 }

</bundles_post_ra>
